<compile_context>
chip_gen: v6e
topology: v6e:2x2x1
jax: 0.10.0
libtpu: 0.0.40
codegen_flags: <defaults>
</compile_context>

<pallas_src>
import math
from functools import partial

import jax
import jax.numpy as jnp
from jax import lax
from jax.experimental import pallas as pl
from jax.experimental.pallas import tpu as pltpu

# clamp(sigmoid(x), 1e-4, 1-1e-4) == sigmoid(clip(x, -LC, +LC))
_LOGIT_CLIP = math.log((1.0 - 1e-4) / 1e-4)
_FOCAL_TILE_ROWS = 2048
_GATHER_DMA_DEPTH = 8          # in-flight row DMAs for the id gather
_ID_CHUNK_LANES = 512          # classifier streaming chunk (lanes)


def _round_up(x, m):
    return ((x + m - 1) // m) * m


# ----------------------------- focal loss kernel -----------------------------

def _focal_kernel(pred_ref, gt_ref, out_ref, *, total_elems, tile_rows):
    """CenterNet focal loss, logit-space; lane-dense per-block partial sums."""
    i = pl.program_id(0)
    x = pred_ref[...]                                    # (tile, 128) f32
    gt = gt_ref[...]
    row = lax.broadcasted_iota(jnp.int32, x.shape, 0) + i * tile_rows
    lane = lax.broadcasted_iota(jnp.int32, x.shape, 1)
    valid = (row * 128 + lane < total_elems).astype(jnp.float32)   # pad mask

    xc = jnp.clip(x, -_LOGIT_CLIP, _LOGIT_CLIP)          # == _sigmoid() clamp
    e = jnp.exp(-xc)                                     # EUP exp
    p = pl.reciprocal(1.0 + e, approx=True)              # EUP recip (frees VALU)
    sp = jnp.log(1.0 + e)                                # EUP log; = -log(p)
    log_p = -sp
    log_1mp = -xc - sp                                   # log(1 - p)

    is_pos = (gt == 1.0).astype(jnp.float32)             # gt.eq(1)
    pos = is_pos * valid
    neg = (1.0 - is_pos) * valid                         # gt.lt(1)
    neg_w = (1.0 - gt) ** 4

    pos_loss = log_p * (1.0 - p) ** 2 * pos
    neg_loss = log_1mp * p * p * neg_w * neg

    # full (8, 128) tile per block: sublane reduce only, no masked writeback
    out_ref[0, 0:1, :] = jnp.sum(pos_loss, axis=0, keepdims=True)
    out_ref[0, 1:2, :] = jnp.sum(neg_loss, axis=0, keepdims=True)
    out_ref[0, 2:3, :] = jnp.sum(pos, axis=0, keepdims=True)
    out_ref[0, 3:8, :] = jnp.zeros((5, 128), jnp.float32)


def focal_loss(hm_logits, hm_gt):
    total = hm_logits.size
    pred = hm_logits.reshape(-1).astype(jnp.float32)
    gt = hm_gt.reshape(-1).astype(jnp.float32)
    flat_pad = _round_up(total, 128)
    if flat_pad != total:
        pred = jnp.pad(pred, (0, flat_pad - total))
        gt = jnp.pad(gt, (0, flat_pad - total))
    rows = flat_pad // 128
    pred2 = pred.reshape(rows, 128)
    gt2 = gt.reshape(rows, 128)

    tile = rows if rows <= _FOCAL_TILE_ROWS else _FOCAL_TILE_ROWS
    rows_pad = _round_up(rows, tile)
    if rows_pad != rows:
        pred2 = jnp.pad(pred2, ((0, rows_pad - rows), (0, 0)))
        gt2 = jnp.pad(gt2, ((0, rows_pad - rows), (0, 0)))
    nb = rows_pad // tile

    tile_bytes = tile * 128 * 4
    vmem_limit = min(96 * 1024 * 1024, max(8 * 1024 * 1024, 6 * tile_bytes))

    partials = pl.pallas_call(
        partial(_focal_kernel, total_elems=total, tile_rows=tile),
        out_shape=jax.ShapeDtypeStruct((nb, 8, 128), jnp.float32),
        grid=(nb,),
        in_specs=[pl.BlockSpec((tile, 128), lambda i: (i, 0)),
                  pl.BlockSpec((tile, 128), lambda i: (i, 0))],
        out_specs=pl.BlockSpec((1, 8, 128), lambda i: (i, 0, 0)),
        compiler_params=pltpu.CompilerParams(
            dimension_semantics=("parallel",),
            vmem_limit_bytes=int(vmem_limit)),
    )(pred2, gt2)

    pos_sum = jnp.sum(partials[:, 0, :])
    neg_sum = jnp.sum(partials[:, 1, :])
    num_pos = jnp.sum(partials[:, 2, :])
    return jnp.where(num_pos == 0,
                     -neg_sum,
                     -(pos_sum + neg_sum) / jnp.maximum(num_pos, 1.0))


# ------------------- reID gather + classifier + CE kernel --------------------

def _id_ce_kernel(ind_ref, tgt_ref, feat_hbm, w_ref, b_ref, out_ref,
                  gath_ref, xn_ref, m_ref, se_ref, tl_ref, sem,
                  *, emb_scale, chunk, depth):
    """Grid axis = classifier nID chunks.  Step 0: overlapped manual DMA gather
    of the needed embedding rows + L2-normalize.  Every step: bf16 MXU matmul
    against one weight chunk + flash-style running LSE / target-logit.  Last
    step: CE with ignore_index=-1, packed into a lane-dense (1,128) output."""
    c = pl.program_id(0)
    n_pad, _ = gath_ref.shape

    @pl.when(c == 0)
    def _gather_and_normalize():
        def _copy(j):
            return pltpu.make_async_copy(
                feat_hbm.at[pl.ds(ind_ref[j], 1), :],
                gath_ref.at[pl.ds(j, 1), :],
                sem.at[j % depth])

        @pl.loop(0, depth)                       # prologue: fill the pipe
        def _prologue(j):
            _copy(j).start()

        @pl.loop(0, n_pad - depth)               # steady state: wait j, issue j+depth
        def _steady(j):
            _copy(j).wait()
            _copy(j + depth).start()

        @pl.loop(n_pad - depth, n_pad)           # epilogue: drain
        def _epilogue(j):
            _copy(j).wait()

        g = gath_ref[...].astype(jnp.float32)
        sq = jnp.sum(g * g, axis=-1, keepdims=True)
        inv = lax.rsqrt(jnp.maximum(sq, 1e-24))  # == F.normalize (eps=1e-12)
        xn_ref[...] = ((emb_scale * inv) * g).astype(jnp.bfloat16)
        m_ref[...] = jnp.full(m_ref.shape, -jnp.inf, jnp.float32)
        se_ref[...] = jnp.zeros(se_ref.shape, jnp.float32)
        tl_ref[...] = jnp.zeros(tl_ref.shape, jnp.float32)

    # streaming log-sum-exp over the current nID chunk
    logits = jnp.dot(xn_ref[...], w_ref[...],
                     preferred_element_type=jnp.float32) + b_ref[...]
    lane = lax.broadcasted_iota(jnp.int32, logits.shape, 1) + c * chunk
    tgt = jnp.maximum(tgt_ref[...], 0)                           # (n_pad, 1)
    m_prev = m_ref[...]
    m_new = jnp.maximum(m_prev, jnp.max(logits, axis=-1, keepdims=True))
    alpha = jnp.exp(m_prev - m_new)
    se_ref[...] = alpha * se_ref[...] + jnp.sum(jnp.exp(logits - m_new),
                                                axis=-1, keepdims=True)
    tl_ref[...] = tl_ref[...] + jnp.sum(
        jnp.where(lane == tgt, logits, 0.0), axis=-1, keepdims=True)
    m_ref[...] = m_new

    @pl.when(c == pl.num_programs(0) - 1)
    def _finalize():
        lse = m_ref[...] + jnp.log(se_ref[...])
        valid = (tgt_ref[...] >= 0).astype(jnp.float32)          # ignore_index=-1
        ce_rows = (lse - tl_ref[...]) * valid                    # (n_pad, 1)
        lane_o = lax.broadcasted_iota(jnp.int32, (n_pad, 128), 1)
        packed = (jnp.where(lane_o == 0, ce_rows, 0.0)
                  + jnp.where(lane_o == 1, valid, 0.0))
        out_ref[...] = jnp.sum(packed, axis=0, keepdims=True)    # lane0=CE, lane1=count


def id_ce_loss(id_nchw, ind, reg_mask, ids, w_t, bias, emb_scale):
    b, e_dim, h, w = id_nchw.shape
    k = ind.shape[1]
    n = b * k
    n_pad = max(_round_up(n, 8), 8)

    # NHWC view of the id head ONLY (model dtype kept; kernel upcasts post-DMA)
    feat = jnp.transpose(id_nchw, (0, 2, 3, 1)).reshape(b * h * w, e_dim)

    flat_ind = (ind.astype(jnp.int32)
                + jnp.arange(b, dtype=jnp.int32)[:, None] * (h * w)).reshape(n)
    flat_ind = jnp.pad(flat_ind, (0, n_pad - n))          # pad rows re-gather row 0

    # rows dropped by `reg_mask > 0` in PyTorch -> ignore_index = -1 here
    tgt = jnp.where(reg_mask.reshape(n) > 0, ids.astype(jnp.int32).reshape(n), -1)
    tgt = jnp.pad(tgt, (0, n_pad - n), constant_values=-1).reshape(n_pad, 1)

    n_id = w_t.shape[1]
    chunk = min(_ID_CHUNK_LANES, _round_up(n_id, 128))
    n_id_pad = _round_up(n_id, chunk)
    num_chunks = n_id_pad // chunk

    # lane-dense padded classifier; padded bias = -1e30 so padded lanes never
    # win the max nor contribute to the LSE.
    w_bf16 = jnp.pad(w_t.astype(jnp.bfloat16), ((0, 0), (0, n_id_pad - n_id)))
    bias_p = jnp.pad(bias.astype(jnp.float32).reshape(1, n_id),
                     ((0, 0), (0, n_id_pad - n_id)), constant_values=-1e30)

    depth = min(_GATHER_DMA_DEPTH, n_pad)
    itemsize = jnp.dtype(feat.dtype).itemsize
    vmem_bytes = (n_pad * e_dim * (itemsize + 2)            # gather + normalized
                  + 3 * e_dim * chunk * 2 + 3 * chunk * 4   # streamed w / bias chunks
                  + 2 * n_pad * chunk * 4                   # logits / exp tiles
                  + 8 * n_pad * 4 + depth * e_dim * itemsize)
    vmem_limit = min(48 * 1024 * 1024, max(8 * 1024 * 1024, 2 * vmem_bytes))

    out = pl.pallas_call(
        partial(_id_ce_kernel, emb_scale=float(emb_scale), chunk=chunk,
                depth=depth),
        out_shape=jax.ShapeDtypeStruct((1, 128), jnp.float32),
        grid_spec=pltpu.PrefetchScalarGridSpec(
            num_scalar_prefetch=1,
            grid=(num_chunks,),
            in_specs=[
                pl.BlockSpec((n_pad, 1), lambda c, ind_r: (0, 0)),      # id targets
                pl.BlockSpec(memory_space=pl.ANY),                      # id feat (HBM)
                pl.BlockSpec((e_dim, chunk), lambda c, ind_r: (0, c)),  # weight chunk
                pl.BlockSpec((1, chunk), lambda c, ind_r: (0, c)),      # bias chunk
            ],
            out_specs=pl.BlockSpec((1, 128), lambda c, ind_r: (0, 0)),
            scratch_shapes=[
                pltpu.VMEM((n_pad, e_dim), feat.dtype),     # gathered rows
                pltpu.VMEM((n_pad, e_dim), jnp.bfloat16),   # normalized * scale
                pltpu.VMEM((n_pad, 1), jnp.float32),        # running max
                pltpu.VMEM((n_pad, 1), jnp.float32),        # running sum-exp
                pltpu.VMEM((n_pad, 1), jnp.float32),        # target logit
                pltpu.SemaphoreType.DMA((depth,)),
            ],
        ),
        compiler_params=pltpu.CompilerParams(
            dimension_semantics=("arbitrary",),
            vmem_limit_bytes=int(vmem_limit)),
    )(flat_ind, tgt, feat, w_bf16, bias_p)

    ce_sum = out[0, 0]
    cnt = out[0, 1]
    return jnp.where(cnt > 0, ce_sum / jnp.maximum(cnt, 1.0), 0.0)


# ----------------------- wh / reg masked L1 (plain JAX) -----------------------

def reg_l1_loss(feat_nchw, mask, ind, target):
    """RegL1Loss: gather B*K rows of a tiny 2-channel head -> plain jnp."""
    b, c, h, w = feat_nchw.shape
    k = ind.shape[1]
    feat = jnp.transpose(feat_nchw, (0, 2, 3, 1)).reshape(b, h * w, c)
    feat = feat.astype(jnp.float32)
    idx = jnp.broadcast_to(ind.astype(jnp.int32)[..., None], (b, k, c))
    pred = jnp.take_along_axis(feat, idx, axis=1)                 # (b, k, c)
    m = mask.astype(jnp.float32)[..., None]
    tgt = target.astype(jnp.float32)
    loss = jnp.sum(jnp.abs(pred * m - tgt * m))
    return loss / (jnp.sum(m) * c + 1e-4)


# -------------------------- decision head (plain jnp) -------------------------

def sigmoid_bce_mean(logits, targets):
    """SigmoidFocalloss(alpha=-1, gamma=0, reduction='mean') == BCEWithLogits.
    Tiny (B,1) tensors -> plain jnp (a pallas_call here is pure overhead)."""
    x = logits.astype(jnp.float32)
    t = targets.astype(jnp.float32)
    bce = jnp.maximum(x, 0.0) - x * t + jnp.log1p(jnp.exp(-jnp.abs(x)))
    return jnp.mean(bce)


# TODO(synk): decode_tr_res / compute_avgiou / compute_card_score operate on
# ragged Python tracking-result lists (no Pallas equivalent); we use fixed-size
# padded box arrays and a reasonable interpretation of the score functions.
def _pairwise_iou_tlwh(a, b):
    ax1, ay1 = a[:, 0], a[:, 1]
    ax2, ay2 = ax1 + a[:, 2], ay1 + a[:, 3]
    bx1, by1 = b[:, 0], b[:, 1]
    bx2, by2 = bx1 + b[:, 2], by1 + b[:, 3]
    ix1 = jnp.maximum(ax1[:, None], bx1[None, :])
    iy1 = jnp.maximum(ay1[:, None], by1[None, :])
    ix2 = jnp.minimum(ax2[:, None], bx2[None, :])
    iy2 = jnp.minimum(ay2[:, None], by2[None, :])
    inter = jnp.clip(ix2 - ix1, 0.0) * jnp.clip(iy2 - iy1, 0.0)
    area_a = (ax2 - ax1) * (ay2 - ay1)
    area_b = (bx2 - bx1) * (by2 - by1)
    union = area_a[:, None] + area_b[None, :] - inter
    return inter / jnp.maximum(union, 1e-6)


def _avg_iou_score(dt, to, thres=0.5):
    iou = _pairwise_iou_tlwh(dt, to)
    best = jnp.max(iou, axis=1)
    return jnp.mean((best >= thres).astype(jnp.float32))


def decision_targets(dt_tlwhs, to_tlwhs):
    iou_scores = jax.vmap(_avg_iou_score)(dt_tlwhs, to_tlwhs)        # (B,)
    n_dt, n_to = dt_tlwhs.shape[1], to_tlwhs.shape[1]
    card = min(n_dt, n_to) / max(n_dt, n_to)
    scores = (card * iou_scores >= 0.7).astype(jnp.float32)
    return 1.0 - scores                                              # (B,)


# ------------------------------ full forward ---------------------------------

def mot_sche_loss_forward(outputs, batch, dt_tlwhs, to_tlwhs, params, opt):
    hm_loss = jnp.float32(0.0)
    wh_loss = jnp.float32(0.0)
    off_loss = jnp.float32(0.0)
    id_loss = jnp.float32(0.0)
    sche_loss = jnp.float32(0.0)
    det_loss = jnp.float32(0.0)

    for s in range(opt["num_stacks"]):
        output = outputs[s]

        if not opt["freeze_detector"]:
            hm_loss = hm_loss + focal_loss(output["hm"], batch["hm"]) / opt["num_stacks"]
            if opt["wh_weight"] > 0:
                wh_loss = wh_loss + reg_l1_loss(
                    output["wh"], batch["reg_mask"], batch["ind"],
                    batch["wh"]) / opt["num_stacks"]
            if opt["reg_offset"] and opt["off_weight"] > 0:
                off_loss = off_loss + reg_l1_loss(
                    output["reg"], batch["reg_mask"], batch["ind"],
                    batch["reg"]) / opt["num_stacks"]
            if opt["id_weight"] > 0:
                id_loss = id_loss + id_ce_loss(
                    output["id"], batch["ind"], batch["reg_mask"], batch["ids"],
                    params["classifier_w_t"], params["classifier_b"],
                    params["emb_scale"])
            det_loss = (opt["hm_weight"] * hm_loss
                        + opt["wh_weight"] * wh_loss
                        + opt["off_weight"] * off_loss)

        if opt["add_decision_head"]:
            sche_target = decision_targets(dt_tlwhs, to_tlwhs).reshape(-1, 1)
            sche_loss = sigmoid_bce_mean(output["initial"], sche_target)

    loss = jnp.float32(0.0)
    loss_stats = {}
    if opt["add_decision_head"]:
        loss = loss + sche_loss * 1.0
        loss_stats["decision_loss"] = sche_loss
    if not opt["freeze_detector"]:
        loss = loss.reshape(1)                                       # unsqueeze(0)
        s_det, s_id = params["s_det"], params["s_id"]
        detector_loss = (jnp.exp(-s_det) * det_loss
                         + jnp.exp(-s_id) * id_loss + (s_det + s_id)) * 0.5
        loss = loss + detector_loss
        loss_stats.update({"hm_loss": hm_loss, "wh_loss": wh_loss,
                           "off_loss": off_loss, "id_loss": id_loss})
    loss_stats["loss"] = loss
    return loss, loss_stats


# ---------------------------------- main --------------------------------------

if __name__ == "__main__":
    opt = dict(num_stacks=1, mse_loss=False, reg_loss="l1", dense_wh=False,
               norm_wh=False, cat_spec_wh=False, hm_weight=1.0, wh_weight=0.1,
               off_weight=1.0, reg_offset=True, id_weight=1.0,
               reid_dim=32, nID=64, freeze_detector=False,
               add_decision_head=True, batch_size=2)

    B, C_HM, H, W = 2, 1, 16, 16
    K, E, NID = 8, opt["reid_dim"], opt["nID"]

    key = jax.random.PRNGKey(0)
    ks = jax.random.split(key, 16)

    outputs = [{
        "hm": jax.random.normal(ks[0], (B, C_HM, H, W), jnp.float32),
        "wh": jax.random.normal(ks[1], (B, 2, H, W), jnp.float32),
        "reg": 0.1 * jax.random.normal(ks[2], (B, 2, H, W), jnp.float32),
        "id": jax.random.normal(ks[3], (B, E, H, W), jnp.float32),
        "initial": jax.random.normal(ks[4], (B, 1), jnp.float32),
    }]

    ind = jax.random.randint(ks[5], (B, K), 0, H * W, dtype=jnp.int32)
    reg_mask = (jax.random.uniform(ks[6], (B, K)) > 0.4).astype(jnp.float32)
    ids = jax.random.randint(ks[7], (B, K), 0, NID, dtype=jnp.int32)
    wh_t = jax.random.uniform(ks[8], (B, K, 2), minval=1.0, maxval=10.0)
    reg_t = jax.random.uniform(ks[9], (B, K, 2), minval=0.0, maxval=1.0)

    hm_base = 0.9 * jax.random.uniform(ks[10], (B, H * W))
    rows_idx = jnp.arange(B)[:, None]
    vals = jnp.where(reg_mask > 0, 1.0, hm_base[rows_idx, ind])
    hm_gt = hm_base.at[rows_idx, ind].set(vals).reshape(B, C_HM, H, W)

    batch = {"hm": hm_gt, "reg_mask": reg_mask, "ind": ind,
             "wh": wh_t, "reg": reg_t, "ids": ids}

    # synthetic (fixed-size) tracking results used for the decision-head target
    dt_tlwhs = jax.random.uniform(ks[11], (B, 5, 4), minval=1.0, maxval=20.0)
    to_tlwhs = dt_tlwhs + 0.5 * jax.random.normal(ks[12], (B, 5, 4))

    # deterministic parameter init (nn.Linear(emb_dim, nID) + uncertainty weights)
    bound = 1.0 / math.sqrt(E)
    cls_w = jax.random.uniform(ks[13], (NID, E), minval=-bound, maxval=bound)
    cls_b = jax.random.uniform(ks[14], (NID,), minval=-bound, maxval=bound)
    params = {
        "classifier_w_t": cls_w.T,                 # (E, nID)
        "classifier_b": cls_b.reshape(1, NID),
        "emb_scale": math.sqrt(2) * math.log(NID - 1),
        "s_det": jnp.full((1,), -1.85, jnp.float32),
        "s_id": jnp.full((1,), -1.05, jnp.float32),
        "s_sche": jnp.full((1,), -1.05, jnp.float32),   # defined in __init__, unused in forward
    }

    loss, loss_stats = mot_sche_loss_forward(outputs, batch, dt_tlwhs, to_tlwhs,
                                             params, opt)
    jax.block_until_ready(loss)
    for v in loss_stats.values():
        jax.block_until_ready(v)
    print("KERNEL_OK")
</pallas_src>

<mosaic_0001>
module attributes {stable_mosaic.version = 11 : i64} {
  func.func @_focal_kernel(%arg0: i32, %arg1: memref<4x128xf32, #tpu.memory_space<vmem>>, %arg2: memref<4x128xf32, #tpu.memory_space<vmem>>, %arg3: memref<1x8x128xf32, #tpu.memory_space<vmem>>) attributes {dimension_semantics = [#tpu.dimension_semantics<parallel>], iteration_bounds = array<i64: 1>, scalar_prefetch = 0 : i64, scratch_operands = 0 : i64, tpu.core_type = #tpu.core_type<tc>, window_params = [{transform_indices = @transform_0, window_bounds = array<i64: 4, 128>}, {transform_indices = @transform_1, window_bounds = array<i64: 4, 128>}, {transform_indices = @transform_2, window_bounds = array<i64: 1, 8, 128>}]} {
    %c0 = arith.constant 0 : index
    %c0_0 = arith.constant 0 : index
    %0 = vector.load %arg1[%c0, %c0_0] : memref<4x128xf32, #tpu.memory_space<vmem>>, vector<4x128xf32>
    %c0_1 = arith.constant 0 : index
    %c0_2 = arith.constant 0 : index
    %1 = vector.load %arg2[%c0_1, %c0_2] : memref<4x128xf32, #tpu.memory_space<vmem>>, vector<4x128xf32>
    %2 = tpu.iota {dimensions = array<i32: 0>} : vector<4x128xi32>
    %c4_i32 = arith.constant 4 : i32
    %3 = arith.muli %arg0, %c4_i32 : i32
    %4 = vector.broadcast %3 : i32 to vector<4x128xi32>
    %5 = arith.addi %2, %4 : vector<4x128xi32>
    %6 = tpu.iota {dimensions = array<i32: 1>} : vector<4x128xi32>
    %c128_i32 = arith.constant 128 : i32
    %7 = vector.broadcast %c128_i32 : i32 to vector<4x128xi32>
    %8 = arith.muli %5, %7 : vector<4x128xi32>
    %9 = arith.addi %8, %6 : vector<4x128xi32>
    %c512_i32 = arith.constant 512 : i32
    %10 = vector.broadcast %c512_i32 : i32 to vector<4x128xi32>
    %11 = arith.cmpi slt, %9, %10 : vector<4x128xi32>
    %12 = arith.extui %11 : vector<4x128xi1> to vector<4x128xi32>
    %13 = arith.sitofp %12 : vector<4x128xi32> to vector<4x128xf32>
    %cst = arith.constant -9.210240e+00 : f32
    %cst_3 = arith.constant 9.210240e+00 : f32
    %14 = vector.broadcast %cst : f32 to vector<4x128xf32>
    %15 = arith.maximumf %14, %0 : vector<4x128xf32>
    %16 = vector.broadcast %cst_3 : f32 to vector<4x128xf32>
    %17 = arith.minimumf %16, %15 : vector<4x128xf32>
    %cst_4 = arith.constant 0.000000e+00 : f32
    %18 = vector.broadcast %cst_4 : f32 to vector<4x128xf32>
    %19 = arith.subf %18, %17 : vector<4x128xf32>
    %20 = math.exp %19 : vector<4x128xf32>
    %cst_5 = arith.constant 1.000000e+00 : f32
    %21 = vector.broadcast %cst_5 : f32 to vector<4x128xf32>
    %22 = arith.addf %21, %20 : vector<4x128xf32>
    %23 = tpu.reciprocal %22 {approx = true} : vector<4x128xf32> -> vector<4x128xf32>
    %cst_6 = arith.constant 1.000000e+00 : f32
    %24 = vector.broadcast %cst_6 : f32 to vector<4x128xf32>
    %25 = arith.addf %24, %20 : vector<4x128xf32>
    %26 = math.log %25 : vector<4x128xf32>
    %cst_7 = arith.constant 0.000000e+00 : f32
    %27 = vector.broadcast %cst_7 : f32 to vector<4x128xf32>
    %28 = arith.subf %27, %26 : vector<4x128xf32>
    %cst_8 = arith.constant 0.000000e+00 : f32
    %29 = vector.broadcast %cst_8 : f32 to vector<4x128xf32>
    %30 = arith.subf %29, %17 : vector<4x128xf32>
    %31 = arith.subf %30, %26 : vector<4x128xf32>
    %cst_9 = arith.constant 1.000000e+00 : f32
    %32 = vector.broadcast %cst_9 : f32 to vector<4x128xf32>
    %33 = arith.cmpf oeq, %1, %32 : vector<4x128xf32>
    %34 = arith.extui %33 : vector<4x128xi1> to vector<4x128xi32>
    %35 = arith.sitofp %34 : vector<4x128xi32> to vector<4x128xf32>
    %36 = arith.mulf %35, %13 : vector<4x128xf32>
    %cst_10 = arith.constant 1.000000e+00 : f32
    %37 = vector.broadcast %cst_10 : f32 to vector<4x128xf32>
    %38 = arith.subf %37, %35 : vector<4x128xf32>
    %39 = arith.mulf %38, %13 : vector<4x128xf32>
    %cst_11 = arith.constant 1.000000e+00 : f32
    %40 = vector.broadcast %cst_11 : f32 to vector<4x128xf32>
    %41 = arith.subf %40, %1 : vector<4x128xf32>
    %42 = arith.mulf %41, %41 : vector<4x128xf32>
    %43 = arith.mulf %42, %42 : vector<4x128xf32>
    %cst_12 = arith.constant 1.000000e+00 : f32
    %44 = vector.broadcast %cst_12 : f32 to vector<4x128xf32>
    %45 = arith.subf %44, %23 : vector<4x128xf32>
    %46 = arith.mulf %45, %45 : vector<4x128xf32>
    %47 = arith.mulf %28, %46 : vector<4x128xf32>
    %48 = arith.mulf %47, %36 : vector<4x128xf32>
    %49 = arith.mulf %31, %23 : vector<4x128xf32>
    %50 = arith.mulf %49, %23 : vector<4x128xf32>
    %51 = arith.mulf %50, %43 : vector<4x128xf32>
    %52 = arith.mulf %51, %39 : vector<4x128xf32>
    %cst_13 = arith.constant dense<0.000000e+00> : vector<128xf32>
    %53 = vector.multi_reduction <add>, %48, %cst_13 [0] : vector<4x128xf32> to vector<128xf32>
    %54 = vector.shape_cast %53 : vector<128xf32> to vector<1x128xf32>
    %c0_14 = arith.constant 0 : index
    %c0_15 = arith.constant 0 : index
    %c0_16 = arith.constant 0 : index
    %55 = vector.load %arg3[%c0_14, %c0_15, %c0_16] : memref<1x8x128xf32, #tpu.memory_space<vmem>>, vector<1x1x128xf32>
    %56 = vector.shape_cast %55 : vector<1x1x128xf32> to vector<1x128xf32>
    %57 = vector.shape_cast %54 : vector<1x128xf32> to vector<1x1x128xf32>
    tpu.vector_store %arg3[%c0_14, %c0_15, %c0_16], %57 {strides = array<i32>} : memref<1x8x128xf32, #tpu.memory_space<vmem>>, vector<1x1x128xf32>,
    %cst_17 = arith.constant dense<0.000000e+00> : vector<128xf32>
    %58 = vector.multi_reduction <add>, %52, %cst_17 [0] : vector<4x128xf32> to vector<128xf32>
    %59 = vector.shape_cast %58 : vector<128xf32> to vector<1x128xf32>
    %c0_18 = arith.constant 0 : index
    %c1 = arith.constant 1 : index
    %c0_19 = arith.constant 0 : index
    %60 = vector.load %arg3[%c0_18, %c1, %c0_19] : memref<1x8x128xf32, #tpu.memory_space<vmem>>, vector<1x1x128xf32>
    %61 = vector.shape_cast %60 : vector<1x1x128xf32> to vector<1x128xf32>
    %62 = vector.shape_cast %59 : vector<1x128xf32> to vector<1x1x128xf32>
    tpu.vector_store %arg3[%c0_18, %c1, %c0_19], %62 {strides = array<i32>} : memref<1x8x128xf32, #tpu.memory_space<vmem>>, vector<1x1x128xf32>,
    %cst_20 = arith.constant dense<0.000000e+00> : vector<128xf32>
    %63 = vector.multi_reduction <add>, %36, %cst_20 [0] : vector<4x128xf32> to vector<128xf32>
    %64 = vector.shape_cast %63 : vector<128xf32> to vector<1x128xf32>
    %c0_21 = arith.constant 0 : index
    %c2 = arith.constant 2 : index
    %c0_22 = arith.constant 0 : index
    %65 = vector.load %arg3[%c0_21, %c2, %c0_22] : memref<1x8x128xf32, #tpu.memory_space<vmem>>, vector<1x1x128xf32>
    %66 = vector.shape_cast %65 : vector<1x1x128xf32> to vector<1x128xf32>
    %67 = vector.shape_cast %64 : vector<1x128xf32> to vector<1x1x128xf32>
    tpu.vector_store %arg3[%c0_21, %c2, %c0_22], %67 {strides = array<i32>} : memref<1x8x128xf32, #tpu.memory_space<vmem>>, vector<1x1x128xf32>,
    %cst_23 = arith.constant 0.000000e+00 : f32
    %68 = vector.broadcast %cst_23 : f32 to vector<5x128xf32>
    %c0_24 = arith.constant 0 : index
    %c3 = arith.constant 3 : index
    %c0_25 = arith.constant 0 : index
    %69 = vector.load %arg3[%c0_24, %c3, %c0_25] : memref<1x8x128xf32, #tpu.memory_space<vmem>>, vector<1x5x128xf32>
    %70 = vector.shape_cast %69 : vector<1x5x128xf32> to vector<5x128xf32>
    %71 = vector.shape_cast %68 : vector<5x128xf32> to vector<1x5x128xf32>
    tpu.vector_store %arg3[%c0_24, %c3, %c0_25], %71 {strides = array<i32>} : memref<1x8x128xf32, #tpu.memory_space<vmem>>, vector<1x5x128xf32>,
    return
  }
  func.func @transform_0(%arg0: i32) -> (i32, i32) {
    %c0_i32 = arith.constant 0 : i32
    %c0_i32_0 = arith.constant 0 : i32
    return %arg0, %c0_i32 : i32, i32
  }
  func.func @transform_1(%arg0: i32) -> (i32, i32) {
    %c0_i32 = arith.constant 0 : i32
    %c0_i32_0 = arith.constant 0 : i32
    return %arg0, %c0_i32 : i32, i32
  }
  func.func @transform_2(%arg0: i32) -> (i32, i32, i32) {
    %c0_i32 = arith.constant 0 : i32
    %c0_i32_0 = arith.constant 0 : i32
    %c0_i32_1 = arith.constant 0 : i32
    return %arg0, %c0_i32, %c0_i32_0 : i32, i32, i32
  }
}

</mosaic_0001>

<bundles_post_ra>
// kernel: tpu_custom_call.1
= control target key start
LH: loop header
LB: loop body
LE: loop exit
PB: predicated region body
PF: predicated region fallthrough
CT: control target
= control target key end

     0   :  { %7 = vsyncpa [#allocation3], 0  ;;  %s230_s0 = inlined_call_operand.hbm [shape: f32[4,128], index: 0, kind: input, shape index: {}]   ;;  %s231_s1 = inlined_call_operand.hbm [shape: f32[4,128], index: 1, kind: input, shape index: {}]   ;;  %s232_s2 = inlined_call_operand.hbm [shape: f32[1,8,128], index: 2, kind: output, shape index: {}]  }
   0x1   :  { %8 = vsyncpa [#allocation6], 0 }
   0x2   :  { %9 = vsyncpa [#allocation4], 0  ;;  %s199_s9 = smov [#allocation2]   ;;  %s200_s11 = smov [#allocation5]  }
   0x3   :  { %s16_s10 = sshll.u32 %s199_s9, 4  ;;  %s26_s12 = sshll.u32 %s200_s11, 4  ;;  %s17_s10 = int_to_ptr.vmem [resolvable:$true] %s16_s10  ;;  %s27_s12 = int_to_ptr.vmem [resolvable:$true] %s26_s12 }
   0x4   :  { %s141_s13 = scalar_lea.vmem %s17_s10, 64  ;;  %p146_p1 = scmp.lt.s32.totalorder %s17_s10, %s17_s10 }
   0x5   :  { %p142_p0 = scmp.ne.s32.totalorder %s17_s10, %s141_s13  ;;  %p147_p2 = scmp.lt.s32.totalorder %s141_s13, %s141_s13 }
   0x7   :  { %p148_p3 = por %p147_p2, %p146_p1 }
   0x9   :  { %p149_p4 = pnand %p148_p3, %p142_p0 }
   0xb   :  { %152 = shalt.err (!%p149_p4)
}
   0xc   :  { %19 = dma.hbm_to_vmem [thread:$0]  %s230_s0, 64, %s17_s10, [#allocation3]  }
   0xd   :  { %s161_s16 = scalar_lea.vmem %s27_s12, 64  ;;  %p166_p6 = scmp.lt.s32.totalorder %s27_s12, %s27_s12 }
   0xe   :  { %p162_p5 = scmp.ne.s32.totalorder %s27_s12, %s161_s16  ;;  %p167_p7 = scmp.lt.s32.totalorder %s161_s16, %s161_s16 }
  0x10   :  { %p168_p8 = por %p167_p7, %p166_p6 }
  0x12   :  { %p169_p9 = pnand %p168_p8, %p162_p5 }
  0x14   :  { %172 = shalt.err (!%p169_p9)
}
  0x15   :  { %29 = dma.hbm_to_vmem [thread:$0]  %s231_s1, 64, %s27_s12, [#allocation6]  }
  0x16   :  { %193 = dma.done.wait [#allocation3], 64  }
  0x17   :  { %194 = vsyncadd [#allocation3], 4294967232 }
  0x18   :  { %195 = dma.done.wait [#allocation6], 64  }
  0x19   :  { %196 = vsyncadd [#allocation6], 4294967232  ;;  %v38_v0 = vlaneseq  ;;  %v201_v1 = vmov 0.0   ;;  %v36_v6 = vld [vmem:[#allocation2] sm:$0xf]  ;;  %vm78_vm2 = vcmask 1043456  }
  0x1a   :  { %103 = vst [vmem:[#allocation7 + $0x3] sm:$0x1f] %v201_v1  ;;  %v37_v7 = vld [vmem:[#allocation5] sm:$0xf]  ;;  %v121_v8 = vclamps-f32 %v36_v6, 9.21024 }
  0x1b   :  { %v39_v2 = vshrl.u32 %v38_v0, 7  ;;  %v44_v3 = vand.u32 127, %v38_v0  ;;  %vm61_vm1 = vcmp.eq.f32.partialorder %v37_v7, 1.0  ;;  %v67_v23 = vsub.f32 1.0, %v37_v7  ;;  %s202_s0 = smov [#allocation7]  }
  0x1c   :  { %v122_v10 = vsel %vm61_vm1, 1.0, %v201_v1  ;;  %v52_v11 = vsub.f32 0.0, %v121_v8  ;;  %s110_s1 = sshll.u32 %s202_s0, 4  ;;  %s111_s1 = int_to_ptr.vmem [resolvable:$true] %s110_s1 }
  0x1d   :  { %v45_v4 = vmul.u32 128, %v39_v2  ;;  %v68_v28 = vmul.f32 %v67_v23, %v67_v23  ;;  %v65_v32 = vsub.f32 1.0, %v122_v10  ;;  %s173_s19 = scalar_lea.vmem %s111_s1, 128  ;;  %p178_p11 = scmp.lt.s32.totalorder %s111_s1, %s111_s1 }
  0x1e   :  { %v53_v13 = vmul.f32 1.442695, %v52_v11  ;;  %p174_p10 = scmp.ne.s32.totalorder %s111_s1, %s173_s19  ;;  %p179_p12 = scmp.lt.s32.totalorder %s173_s19, %s173_s19 }
  0x1f   :  { %v46_v5 = vadd.s32 %v45_v4, %v44_v3  ;;  %v69_v34 = vmul.f32 %v68_v28, %v68_v28 }
  0x20   :  { %127 = vpow2.f32 %v53_v13  ;;  %p180_p13 = por %p179_p12, %p178_p11 }
  0x21   :  { %vm47_vm0 = vcmp.lt.s32.totalorder %v46_v5, 512 }
  0x22   :  { %v120_v9 = vsel %vm47_vm0, 1.0, %v201_v1  ;;  %p181_p0 = pnand %p180_p13, %p174_p10 }
  0x23   :  { %v64_v12 = vmul.f32 %v122_v10, %v120_v9  ;;  %v66_v37 = vmul.f32 %v120_v9, %v65_v32 }
  0x25   :  { %v95_v14 = vsel %vm78_vm2, %v64_v12, 0.0 }
  0x26   :  { %v96_v15 = vrot.slane %v95_v14, 4 }
  0x28   :  { %v97_v16 = vadd.f32 %v96_v15, %v95_v14 }
  0x2a   :  { %v98_v17 = vrot.slane %v97_v16, 2 }
  0x2c   :  { %v99_v18 = vadd.f32 %v98_v17, %v97_v16 }
  0x2d   :  { %v128_v21 = vpop.eup %127 }
  0x2e   :  { %v100_v19 = vrot.slane %v99_v18, 1  ;;  %v55_v22 = vadd.f32 1.0, %v128_v21 }
  0x30   :  { %v101_v20 = vadd.f32 %v100_v19, %v99_v18  ;;  %129 = vrcp.f32 %v55_v22 }
  0x31   :  { %131 = vlog2.f32 %v55_v22 }
  0x32   :  { %102 = vst [vmem:[#allocation7 + $0x2] sm:$0x1] %v101_v20 }
  0x3d   :  { %v130_v24 = vpop.eup %129 }
  0x3e   :  { %v132_v25 = vpop.eup %131  ;;  %v70_v26 = vsub.f32 1.0, %v130_v24 }
  0x3f   :  { %v58_v27 = vmul.f32 0.6931472, %v132_v25 }
  0x40   :  { %v71_v29 = vmul.f32 %v70_v26, %v70_v26 }
  0x41   :  { %v59_v30 = vsub.f32 0.0, %v58_v27  ;;  %v60_v31 = vsub.f32 %v52_v11, %v58_v27 }
  0x43   :  { %v72_v33 = vmul.f32 %v71_v29, %v59_v30  ;;  %v74_v35 = vmul.f32 %v130_v24, %v60_v31 }
  0x45   :  { %v73_v36 = vmul.f32 %v72_v33, %v64_v12  ;;  %v75_v38 = vmul.f32 %v130_v24, %v74_v35 }
  0x47   :  { %v79_v39 = vsel %vm78_vm2, %v73_v36, 0.0  ;;  %v76_v40 = vmul.f32 %v75_v38, %v69_v34 }
  0x48   :  { %v80_v41 = vrot.slane %v79_v39, 4 }
  0x49   :  { %v77_v42 = vmul.f32 %v76_v40, %v66_v37 }
  0x4a   :  { %v81_v43 = vadd.f32 %v80_v41, %v79_v39 }
  0x4b   :  { %v87_v44 = vsel %vm78_vm2, %v77_v42, 0.0 }
  0x4c   :  { %v82_v45 = vrot.slane %v81_v43, 2  ;;  %v88_v46 = vrot.slane %v87_v44, 4 }
  0x4e   :  { %v83_v47 = vadd.f32 %v82_v45, %v81_v43  ;;  %v89_v48 = vadd.f32 %v88_v46, %v87_v44 }
  0x50   :  { %v84_v49 = vrot.slane %v83_v47, 1  ;;  %v90_v50 = vrot.slane %v89_v48, 2 }
  0x52   :  { %v85_v51 = vadd.f32 %v84_v49, %v83_v47  ;;  %v91_v52 = vadd.f32 %v90_v50, %v89_v48 }
  0x54   :  { %86 = vst [vmem:[#allocation7] sm:$0x1] %v85_v51  ;;  %v92_v53 = vrot.slane %v91_v52, 1 }
  0x56   :  { %v93_v54 = vadd.f32 %v92_v53, %v91_v52 }
  0x58   :  { %94 = vst [vmem:[#allocation7 + $0x1] sm:$0x1] %v93_v54 }
  0x59   :  { %184 = shalt.err (!%p181_p0)
}
  0x5a   :  { %113 = dma.vmem_to_hbm [thread:$0]  %s111_s1, 128, %s232_s2, [#allocation4]  }
  0x5b   :  { %197 = dma.done.wait [#allocation4], 128  }
  0x5c   :  { %198 = vsyncadd [#allocation4], 4294967168 }
  0x5d   :  { %117 = vsyncpa [#allocation3], 1 }
  0x5e   :  { %118 = vsyncpa [#allocation6], 1 }
  0x5f   :  { %119 = vsyncpa [#allocation4], 1 }

</bundles_post_ra>
